<compile_context>
chip_gen: v7x
topology: tpu7x:2x2x1
jax: 0.10.0
libtpu: 0.0.40
codegen_flags: <defaults>
</compile_context>

<pallas_src>
import functools

import jax
import jax.numpy as jnp
from jax import lax
from jax.experimental import pallas as pl
from jax.experimental.pallas import tpu as pltpu

_LANE = 128
_SUBCHUNK_F32_BYTES = 512 * 1024  # bound on per-chunk f32 working set inside the kernel


def _round_up(a: int, b: int) -> int:
    return -(-a // b) * b


def _round_down(a: int, b: int) -> int:
    return max(b, (a // b) * b)


def _vmem_capacity_bytes() -> int:
    try:
        return int(pltpu.get_tpu_info().vmem_capacity_bytes)
    except Exception:
        return 128 * 1024 * 1024  # assume v5e/v6e-class if the query is unavailable


def _plan(rows, hw, itemsize, tile_rows=None, hw_tile=None):
    """Pick (tm, tk) block sizes and in-kernel chunking from a byte budget."""
    pack = max(8, 32 // itemsize)          # sublane packing: 8 f32, 16 bf16, 32 int8/fp8
    hw_pad = _round_up(hw, _LANE)          # lane padding of the VMEM tile
    rows_pad = _round_up(rows, pack)

    cap = _vmem_capacity_bytes()
    small_vmem = cap <= 96 * (1 << 20)     # v7x-class: 64 MiB VMEM, much faster HBM
    # Total VMEM spent on pipelined buffers (input pair + output pair + accumulator).
    # Bigger steps on v7x amortize the ~0.35us per-grid-step overhead against ~3.2 TB/s HBM.
    vmem_target = (16 if small_vmem else 8) * (1 << 20)

    # ---- reduction (hw) axis: one full-width block if affordable, else 128-multiples.
    if hw_tile is not None:
        tk = min(_round_up(max(int(hw_tile), _LANE), _LANE), hw_pad)
    elif pack * hw_pad * itemsize * 2 <= vmem_target:
        tk = hw_pad
    else:
        tk = _round_down((vmem_target // 2) // (pack * itemsize), _LANE)
        tk = min(tk, hw_pad)
    single = tk >= hw_pad

    in_cols = hw_pad if single else tk
    # Per-row VMEM cost: double-buffered input row + double-buffered (lane-padded to 128)
    # output row + (multi-k only) one f32 accumulator row.
    row_cost = 2 * in_cols * itemsize + 2 * _LANE * itemsize
    if not single:
        row_cost += _LANE * 4

    # ---- row axis: byte-capped tile, validated user override, >=4-step preference.
    if tile_rows is not None:
        tm = min(_round_up(max(int(tile_rows), pack), pack), rows_pad)
    else:
        tm = _round_down(vmem_target // row_cost, pack)
        tm = min(tm, rows_pad)
        min_steps = 4
        if rows_pad < min_steps * tm:
            tm_split = _round_up(-(-rows_pad // min_steps), pack)
            tm_floor = min(tm, _round_down((1 << 20) // (in_cols * itemsize), pack))
            tm = max(min(tm, tm_split), tm_floor)
    tm = max(tm, pack)

    # ---- in-kernel sub-chunking (bounds the f32 intermediate of cast+reduce).
    if single:
        rsub = min(_round_down(_SUBCHUNK_F32_BYTES // (hw_pad * 4), pack), tm)
        while tm % rsub:
            rsub -= pack
        nsub = tm // rsub
        lsub, nlsub = in_cols, 1
    else:
        lsub = min(_round_down(_SUBCHUNK_F32_BYTES // (tm * 4), _LANE), tk)
        while tk % lsub:
            lsub -= _LANE
        nlsub = tk // lsub
        rsub, nsub = tm, 1

    demand = tm * row_cost
    vmem_limit = max(demand + (8 << 20), 32 << 20)
    vmem_limit = min(vmem_limit, (48 << 20) if small_vmem else (96 << 20))

    return dict(single=single, tm=tm, tk=tk, rsub=rsub, nsub=nsub,
                lsub=lsub, nlsub=nlsub, vmem_limit=vmem_limit)


def _spoc_kernel_single(x_ref, o_ref, *, inv_hw, rsub, nsub):
    """Full H*W in one block: reduce row sub-chunks and store the means directly."""
    def _one(rows_slice):
        s = jnp.sum(x_ref[rows_slice, :], axis=-1, keepdims=True, dtype=jnp.float32)
        o_ref[rows_slice, :] = (s * inv_hw).astype(o_ref.dtype)

    if nsub == 1:
        _one(slice(None))
    else:
        def body(c, carry):
            r0 = pl.multiple_of(c * rsub, rsub)
            _one(pl.ds(r0, rsub))
            return carry
        lax.fori_loop(0, nsub, body, 0, unroll=min(4, nsub))


def _spoc_kernel_multi(x_ref, o_ref, acc_ref, *, inv_hw, hw, tk, lsub, nlsub):
    """H*W split across the last grid axis: f32 accumulator, finalize on the last step."""
    k = pl.program_id(1)

    @pl.when(k == 0)
    def _init():
        acc_ref[...] = jnp.zeros_like(acc_ref)

    ragged = (hw % tk) != 0        # static: last hw block extends past the array
    base = k * tk                  # hw offset of this block

    def _accum(xs, off):
        if ragged:
            lane = lax.broadcasted_iota(jnp.int32, xs.shape, 1)
            xs = jnp.where((lane + off) < (hw - base), xs, jnp.zeros_like(xs))
        acc_ref[...] += jnp.sum(xs, axis=-1, keepdims=True, dtype=jnp.float32)

    if nlsub == 1:
        _accum(x_ref[...], 0)
    else:
        def body(c, carry):
            off = pl.multiple_of(c * lsub, lsub)
            _accum(x_ref[:, pl.ds(off, lsub)], off)
            return carry
        lax.fori_loop(0, nlsub, body, 0, unroll=min(4, nlsub))

    @pl.when(k == pl.num_programs(1) - 1)
    def _finalize():
        o_ref[...] = (acc_ref[...] * inv_hw).astype(o_ref.dtype)


def spoc(x: jax.Array, *, tile_rows=None, hw_tile=None) -> jax.Array:
    """Global average pooling: (N, C, H, W) -> (N, C, 1, 1)."""
    n, c, h, w = x.shape
    rows, hw = n * c, h * w
    x2d = x.reshape(rows, hw)
    itemsize = jnp.dtype(x.dtype).itemsize

    p = _plan(rows, hw, itemsize, tile_rows=tile_rows, hw_tile=hw_tile)
    tm = p["tm"]
    inv_hw = 1.0 / float(hw)
    cost = pl.CostEstimate(flops=rows * hw, transcendentals=0,
                           bytes_accessed=rows * hw * itemsize + rows * itemsize)

    if p["single"]:
        kernel = functools.partial(_spoc_kernel_single, inv_hw=inv_hw,
                                   rsub=p["rsub"], nsub=p["nsub"])
        out2d = pl.pallas_call(
            kernel,
            out_shape=jax.ShapeDtypeStruct((rows, 1), x.dtype),
            grid=(pl.cdiv(rows, tm),),
            in_specs=[pl.BlockSpec((tm, hw), lambda i: (i, 0))],
            out_specs=pl.BlockSpec((tm, 1), lambda i: (i, 0)),
            compiler_params=pltpu.CompilerParams(
                dimension_semantics=("parallel",),
                vmem_limit_bytes=p["vmem_limit"]),
            cost_estimate=cost,
        )(x2d)
    else:
        tk = p["tk"]
        kernel = functools.partial(_spoc_kernel_multi, inv_hw=inv_hw, hw=hw, tk=tk,
                                   lsub=p["lsub"], nlsub=p["nlsub"])
        out2d = pl.pallas_call(
            kernel,
            out_shape=jax.ShapeDtypeStruct((rows, 1), x.dtype),
            grid=(pl.cdiv(rows, tm), pl.cdiv(hw, tk)),
            in_specs=[pl.BlockSpec((tm, tk), lambda i, k: (i, k))],
            out_specs=pl.BlockSpec((tm, 1), lambda i, k: (i, 0)),
            scratch_shapes=[pltpu.VMEM((tm, 1), jnp.float32)],
            compiler_params=pltpu.CompilerParams(
                dimension_semantics=("parallel", "arbitrary"),
                vmem_limit_bytes=p["vmem_limit"]),
            cost_estimate=cost,
        )(x2d)

    return out2d.reshape(n, c, 1, 1)


if __name__ == "__main__":
    key = jax.random.PRNGKey(0)
    k1, k2, k3, k4, k5 = jax.random.split(key, 5)

    # Small NCHW shape consistent with the module's forward.
    x = jax.random.normal(k1, (2, 4, 16, 16), dtype=jnp.float32)
    out = spoc(x)
    jax.block_until_ready(out)
    ref = jnp.mean(x, axis=(2, 3), keepdims=True)
    assert out.shape == (2, 4, 1, 1), out.shape
    assert jnp.allclose(out, ref, atol=1e-5, rtol=1e-5)

    # Multi-tile row grid with a ragged tail (rows=20, tile_rows=8 -> 3 row tiles).
    x2 = jax.random.normal(k2, (5, 4, 8, 8), dtype=jnp.float32)
    out2 = spoc(x2, tile_rows=8)
    jax.block_until_ready(out2)
    ref2 = jnp.mean(x2, axis=(2, 3), keepdims=True)
    assert jnp.allclose(out2, ref2, atol=1e-5, rtol=1e-5)

    # bf16 path: native-dtype DMA with f32 accumulation in-kernel.
    x3 = jax.random.normal(k3, (2, 8, 16, 16), dtype=jnp.bfloat16)
    out3 = spoc(x3)
    jax.block_until_ready(out3)
    ref3 = jnp.mean(x3.astype(jnp.float32), axis=(2, 3), keepdims=True).astype(jnp.bfloat16)
    assert jnp.allclose(out3.astype(jnp.float32), ref3.astype(jnp.float32),
                        atol=2e-2, rtol=2e-2)

    # Forced H*W tiling: exercises the multi-k accumulator path and the ragged-lane
    # masking (hw=196, tk=128 -> 2 k-steps, last one 68 valid lanes).
    x4 = jax.random.normal(k4, (2, 4, 14, 14), dtype=jnp.float32)
    out4 = spoc(x4, hw_tile=128)
    jax.block_until_ready(out4)
    ref4 = jnp.mean(x4, axis=(2, 3), keepdims=True)
    assert jnp.allclose(out4, ref4, atol=1e-5, rtol=1e-5)

    # Larger N*C: exercises multiple byte-capped row tiles plus the in-kernel
    # sub-chunked reduce loop (nsub > 1).
    x5 = jax.random.normal(k5, (4, 2048, 16, 16), dtype=jnp.float32)
    out5 = spoc(x5)
    jax.block_until_ready(out5)
    ref5 = jnp.mean(x5, axis=(2, 3), keepdims=True)
    assert jnp.allclose(out5, ref5, atol=1e-5, rtol=1e-5)

    print("KERNEL_OK")
</pallas_src>

<mosaic_0001>
module attributes {stable_mosaic.version = 11 : i64} {
  func.func @_spoc_kernel_single(%arg0: i32, %arg1: memref<8x256xf32, #tpu.memory_space<vmem>>, %arg2: memref<8x1xf32, #tpu.memory_space<vmem>>) attributes {dimension_semantics = [#tpu.dimension_semantics<parallel>], iteration_bounds = array<i64: 1>, scalar_prefetch = 0 : i64, scratch_operands = 0 : i64, tpu.core_type = #tpu.core_type<tc>, window_params = [{transform_indices = @transform_0, window_bounds = array<i64: 8, 256>}, {transform_indices = @transform_1, window_bounds = array<i64: 8, 1>}]} {
    %c0 = arith.constant 0 : index
    %c0_0 = arith.constant 0 : index
    %0 = vector.load %arg1[%c0, %c0_0] : memref<8x256xf32, #tpu.memory_space<vmem>>, vector<8x256xf32>
    %cst = arith.constant dense<0.000000e+00> : vector<8xf32>
    %1 = vector.multi_reduction <add>, %0, %cst [1] : vector<8x256xf32> to vector<8xf32>
    %2 = vector.shape_cast %1 : vector<8xf32> to vector<8x1xf32>
    %cst_1 = arith.constant 3.906250e-03 : f32
    %3 = vector.broadcast %cst_1 : f32 to vector<8x1xf32>
    %4 = arith.mulf %2, %3 : vector<8x1xf32>
    %c0_2 = arith.constant 0 : index
    %c0_3 = arith.constant 0 : index
    %5 = vector.load %arg2[%c0_2, %c0_3] : memref<8x1xf32, #tpu.memory_space<vmem>>, vector<8x1xf32>
    tpu.vector_store %arg2[%c0_2, %c0_3], %4 {strides = array<i32>} : memref<8x1xf32, #tpu.memory_space<vmem>>, vector<8x1xf32>,
    return
  }
  func.func @transform_0(%arg0: i32) -> (i32, i32) {
    %c0_i32 = arith.constant 0 : i32
    %c0_i32_0 = arith.constant 0 : i32
    return %arg0, %c0_i32 : i32, i32
  }
  func.func @transform_1(%arg0: i32) -> (i32, i32) {
    %c0_i32 = arith.constant 0 : i32
    %c0_i32_0 = arith.constant 0 : i32
    return %arg0, %c0_i32 : i32, i32
  }
}

</mosaic_0001>

<bundles_post_ra>
// kernel: tpu_custom_call.1
= control target key start
LH: loop header
LB: loop body
LE: loop exit
PB: predicated region body
PF: predicated region fallthrough
CT: control target
= control target key end

     0   :  { %6 = vsyncpa [#allocation3], 0  ;;  %s58_s6 = smov [#allocation2]   ;;  %s84_s0 = inlined_call_operand.hbm [shape: f32[8,256], index: 0, kind: input, shape index: {}]   ;;  %s85_s1 = inlined_call_operand.vmem [shape: f32[8,1], index: 1, kind: output, shape index: {}]  }
   0x1   :  { %s13_s7 = sshll.u32 %s58_s6, 4  ;;  %s34_s10 = scalar_lea.hbm %s84_s0, 256  ;;  %s14_s7 = int_to_ptr.vmem [resolvable:$true] %s13_s7 }
   0x2   :  { %p35_p0 = scmp.ne.s32.totalorder %s84_s0, %s34_s10  ;;  %p38_p1 = scmp.lt.u32.totalorder %s34_s10, %s84_s0 }
   0x4   :  { %p40_p2 = pnand %p38_p1, %p35_p0 }
   0x6   :  { %43 = shalt.err (!%p40_p2)
}
   0x7   :  { %s44_s15 = scalar_lea.vmem %s14_s7, 256  ;;  %p49_p4 = scmp.lt.s32.totalorder %s14_s7, %s14_s7 }
   0x8   :  { %p45_p3 = scmp.ne.s32.totalorder %s14_s7, %s44_s15  ;;  %p50_p5 = scmp.lt.s32.totalorder %s44_s15, %s44_s15 }
   0xa   :  { %p51_p6 = por %p50_p5, %p49_p4 }
   0xc   :  { %p52_p7 = pnand %p51_p6, %p45_p3 }
   0xe   :  { %55 = shalt.err (!%p52_p7)
}
   0xf   :  { %16 = dma.hbm_to_vmem [thread:$0]  %s84_s0, 256, %s14_s7, [#allocation3]  }
  0x10   :  { %56 = dma.done.wait [#allocation3], 256  }
  0x11   :  { %57 = vsyncadd [#allocation3], 4294967040  ;;  %v20_v0 = vld [vmem:[#allocation2] sm:$0xff]  ;;  %v21_v1 = vld [vmem:[#allocation2 + $0x8] sm:$0xff]  ;;  %vm26_vm0 = vcmask 7168  }
  0x12   :  { %v22_v2 = vadd.f32 %v21_v1, %v20_v0 }
  0x14   :  { %23 = vadd.xlane.f32.xlu0 %v22_v2 }
  0xa1   :  { %v24_v3 = vpop.xlane.xlu0 %23 }
  0xa2   :  { %v25_v4 = vmul.f32 0.00390625, %v24_v3 }
  0xa4   :  { %27 = vst.msk [vmem:[%s85_s1] sm:$0xff] %vm26_vm0, %v25_v4 }
  0xa5   :  { %32 = vsyncpa [#allocation3], 1 }

</bundles_post_ra>
